<compile_context>
chip_gen: v5e
topology: v5e:2x2
jax: 0.10.0
libtpu: 0.0.40
codegen_flags: <defaults>
</compile_context>

<pallas_src>
import functools

import jax
import jax.numpy as jnp
from jax.experimental import pallas as pl
from jax.experimental.pallas import tpu as pltpu

_ROWS = 8                       # xyz padded up to one full sublane group
_MAX_STEPS = 128                # per-step losses live on lanes of one (8,128) tile
_S_TILE_VMEM_BUDGET = 8 << 20   # budget for the double-buffered incidence tile


def _round_up(n, m):
    return ((n + m - 1) // m) * m


def _choose_tile_f(v_pad, num_faces):
    """Face-tile width: multiple of 128, bounded by the incidence-tile budget."""
    f_pad = _round_up(max(num_faces, 1), 128)
    for cand in (512, 256):
        if f_pad >= cand and 2 * v_pad * 3 * cand * 2 <= _S_TILE_VMEM_BUDGET:
            return cand
    return 128


def _edge_loss_kernel(src_ref, dvm_ref, s_ref, loss_ref, verts_ref, *,
                      inv_num_faces, tile_f):
    t = pl.program_id(0)               # face-tile axis (outer, "arbitrary")
    s = pl.program_id(1)               # step axis (inner: S tile stays resident)
    nt = pl.num_programs(0)
    ns = pl.num_programs(1)

    @pl.when(jnp.logical_and(t == 0, s == 0))
    def _init():
        loss_ref[...] = jnp.zeros_like(loss_ref)

    # offset_verts: new_verts = src + deform * mask (mask folded into dvm).
    verts_t = src_ref[...] + dvm_ref[0]                       # (8, Vp) f32
    verts_ref[0] = verts_t

    # All 3*tile_f signed edge vectors of this face tile in one MXU matmul.
    # S is stored bf16 ({-1,0,+1} is exact) and cast up so the dot stays f32.
    edges = jnp.dot(verts_t, s_ref[...].astype(jnp.float32),
                    preferred_element_type=jnp.float32)       # (8, 3*tile_f)

    sq = edges * edges
    len2 = sq[0:1, :] + sq[1:2, :] + sq[2:3, :]                # (1, 3*tile_f)
    # TODO(synk): clamp len2 away from 0 before sqrt if this kernel is ever
    # differentiated (forward value at 0 is fine, its gradient is not).
    lengths = jnp.sqrt(len2)

    # lengths = [e0 | e1 | e2] per tile; a lane roll by tile_f (128-multiple,
    # cheap XLU op on a slot separate from the VPU) pairs each group with its
    # cyclic neighbour, so one sub+square+sum gives
    # (e0-e1)^2 + (e1-e2)^2 + (e2-e0)^2.  Padded faces are all-zero and cancel.
    diff = lengths - pltpu.roll(lengths, shift=tile_f, axis=1)
    partial = jnp.sum(diff * diff)

    # Accumulate this step's partial into lane `s` of the resident loss tile.
    lane = jax.lax.broadcasted_iota(jnp.int32, loss_ref.shape, 1)
    loss_ref[...] = loss_ref[...] + jnp.where(lane == s, partial, 0.0)

    @pl.when(jnp.logical_and(t == nt - 1, s == ns - 1))
    def _finalize():
        loss_ref[...] = loss_ref[...] * inv_num_faces


def _signed_incidence(faces, v_pad, tile_f, num_tiles):
    """(v_pad, num_tiles*3*tile_f) bf16 incidence matrix.

    For face f (tile t = f // tile_f, slot j = f % tile_f) and edge k, column
    t*3*tile_f + k*tile_f + j holds +1 at faces[f, k] and -1 at
    faces[f, (k+1) % 3], so verts_T @ S yields every edge vector v_k - v_{k+1}.
    Built once outside pallas_call; faces never change across the optimizer loop.
    """
    faces = jnp.asarray(faces, jnp.int32)
    num_faces = faces.shape[0]
    f_idx = jnp.arange(num_faces, dtype=jnp.int32)
    tile_idx = f_idx // tile_f
    slot_idx = f_idx % tile_f
    s = jnp.zeros((v_pad, num_tiles * 3 * tile_f), jnp.float32)
    for k in range(3):
        cols = tile_idx * (3 * tile_f) + k * tile_f + slot_idx
        s = s.at[faces[:, k], cols].add(1.0)
        s = s.at[faces[:, (k + 1) % 3], cols].add(-1.0)
    return s.astype(jnp.bfloat16)


def mesh_edge_loss_custom_pallas(src_vts, deform_steps, mask, faces):
    """Edge loss + offset vertices for `num_steps` deform candidates of one mesh.

    Args:
      src_vts:      (V, 3) float32 vertices.
      deform_steps: (num_steps, V, 3) (or (V, 3)) float32 vertex offsets.
      mask:         (V, 3) float32 multiplicative mask on the offsets.
      faces:        (F, 3) integer vertex indices.
    Returns:
      losses:    (num_steps,) float32 mesh_edge_loss_custom per step.
      new_verts: (num_steps, V, 3) float32 offset vertices per step.
    """
    src_vts = jnp.asarray(src_vts, jnp.float32)
    deform_steps = jnp.asarray(deform_steps, jnp.float32)
    if deform_steps.ndim == 2:
        deform_steps = deform_steps[None]
    mask = jnp.asarray(mask, jnp.float32)
    num_steps = deform_steps.shape[0]
    num_verts = src_vts.shape[0]
    num_faces = int(faces.shape[0])
    if num_steps > _MAX_STEPS:
        raise ValueError(f"num_steps must be <= {_MAX_STEPS}")

    masked_deform = deform_steps * mask[None]        # fold mask once per call

    if num_faces == 0 or num_verts == 0:
        # Empty mesh: the reference loss is defined to be 0.
        return (jnp.zeros((num_steps,), jnp.float32),
                src_vts[None] + masked_deform)

    v_pad = _round_up(num_verts, 128)
    tile_f = _choose_tile_f(v_pad, num_faces)
    num_tiles = -(-num_faces // tile_f)

    def lane_dense(x):                               # (..., V, 3) -> (..., 8, Vp)
        pad = [(0, 0)] * (x.ndim - 2) + [(0, v_pad - num_verts), (0, _ROWS - 3)]
        return jnp.swapaxes(jnp.pad(x, pad), -1, -2)

    src_t = lane_dense(src_vts)                      # (8, Vp)
    dvm_t = lane_dense(masked_deform)                # (num_steps, 8, Vp)
    s_mat = _signed_incidence(faces, v_pad, tile_f, num_tiles)

    kernel = functools.partial(_edge_loss_kernel,
                               inv_num_faces=1.0 / num_faces, tile_f=tile_f)

    loss_tile, verts_out = pl.pallas_call(
        kernel,
        grid=(num_tiles, num_steps),
        in_specs=[
            # src verts: constant block -> fetched once, resident for the call.
            pl.BlockSpec((_ROWS, v_pad), lambda t, s: (0, 0)),
            # per-step masked deform offsets.
            pl.BlockSpec((1, _ROWS, v_pad), lambda t, s: (s, 0, 0)),
            # incidence tile: depends on the face tile only, so it stays
            # resident across the inner step axis (fetched once per tile).
            pl.BlockSpec((v_pad, 3 * tile_f), lambda t, s: (0, t)),
        ],
        out_specs=(
            # resident per-step loss accumulator tile (row 0, lane = step).
            pl.BlockSpec((_ROWS, 128), lambda t, s: (0, 0)),
            # offset vertices per step.
            pl.BlockSpec((1, _ROWS, v_pad), lambda t, s: (s, 0, 0)),
        ),
        out_shape=(
            jax.ShapeDtypeStruct((_ROWS, 128), jnp.float32),
            jax.ShapeDtypeStruct((num_steps, _ROWS, v_pad), jnp.float32),
        ),
        compiler_params=pltpu.CompilerParams(
            dimension_semantics=("arbitrary", "arbitrary"),
            vmem_limit_bytes=32 * 1024 * 1024,
        ),
    )(src_t, dvm_t, s_mat)

    losses = loss_tile[0, :num_steps]
    new_verts = jnp.swapaxes(verts_out[:, :3, :num_verts], -1, -2)
    return losses, new_verts


def mesh2point_optimizer_forward(src_vts, src_faces, trg_vts, trg_color,
                                 return_verts=False, exclude_idx=None):
    """Pallas implementation of the Mesh2PointOptimizer forward hot path."""
    num_verts = src_vts.shape[0]
    # Single hot-path step at deform_verts = 0 (the untranslated SGD loop would
    # feed new deform candidates through the same fused-step kernel).
    deform_steps = jnp.zeros((1, num_verts, 3), jnp.float32)
    mask = jnp.ones((num_verts, 3), jnp.float32)
    if exclude_idx is not None and len(exclude_idx) > 0:
        mask = mask.at[jnp.asarray(exclude_idx, dtype=jnp.int32), :].set(0.0)

    losses, verts_steps = mesh_edge_loss_custom_pallas(
        src_vts, deform_steps, mask, src_faces)
    loss, new_verts = losses[0], verts_steps[0]
    del trg_vts, trg_color  # only consumed by the untranslated loss terms

    if return_verts:
        return new_verts, loss
    # TODO(synk): the original returns a trimesh.Trimesh; return the raw
    # (verts, faces) pair instead of faking the trimesh dependency.
    return (new_verts, jnp.asarray(src_faces, jnp.int32)), loss


def _edge_loss_ref(verts, faces):
    v0 = verts[faces[:, 0]]
    v1 = verts[faces[:, 1]]
    v2 = verts[faces[:, 2]]
    e0 = jnp.linalg.norm(v0 - v1, axis=1)
    e1 = jnp.linalg.norm(v1 - v2, axis=1)
    e2 = jnp.linalg.norm(v2 - v0, axis=1)
    mse = lambda a, b: jnp.mean((a - b) ** 2)
    return mse(e0, e1) + mse(e1, e2) + mse(e2, e0)


if __name__ == "__main__":
    key = jax.random.PRNGKey(0)
    k1, k2, k3, k4, k5, k6, k7 = jax.random.split(key, 7)

    # --- module-sized forward (single hot-path step at deform = 0) ---
    V, F, P = 64, 96, 128
    src_vts = jax.random.normal(k1, (V, 3), dtype=jnp.float32)
    src_faces = jax.random.randint(k2, (F, 3), 0, V, dtype=jnp.int32)
    trg_vts = jax.random.normal(k3, (P, 3), dtype=jnp.float32)
    trg_color = jax.random.uniform(k4, (P, 3), dtype=jnp.float32)

    new_verts, loss = mesh2point_optimizer_forward(
        src_vts, src_faces, trg_vts, trg_color,
        return_verts=True, exclude_idx=[0, 1])
    jax.block_until_ready((new_verts, loss))

    ref_loss = _edge_loss_ref(src_vts, src_faces)
    assert jnp.allclose(loss, ref_loss, rtol=1e-4, atol=1e-5), (loss, ref_loss)
    assert jnp.allclose(new_verts, src_vts, atol=1e-6)

    # --- fused multi-step / multi-tile path (several deform candidates, F > tile) ---
    V2, F2, STEPS = 200, 300, 3
    src2 = jax.random.normal(k5, (V2, 3), dtype=jnp.float32)
    faces2 = jax.random.randint(k6, (F2, 3), 0, V2, dtype=jnp.int32)
    deform2 = 0.05 * jax.random.normal(k7, (STEPS, V2, 3), dtype=jnp.float32)
    mask2 = jnp.ones((V2, 3), jnp.float32).at[jnp.arange(4), :].set(0.0)

    losses2, verts2 = mesh_edge_loss_custom_pallas(src2, deform2, mask2, faces2)
    jax.block_until_ready((losses2, verts2))
    for i in range(STEPS):
        ref_v = src2 + deform2[i] * mask2
        assert jnp.allclose(verts2[i], ref_v, atol=1e-6)
        ref_l = _edge_loss_ref(ref_v, faces2)
        assert jnp.allclose(losses2[i], ref_l, rtol=1e-4, atol=1e-5), (
            i, losses2[i], ref_l)

    print("KERNEL_OK")
</pallas_src>

<mosaic_0001>
module attributes {stable_mosaic.version = 11 : i64} {
  func.func @_edge_loss_kernel(%arg0: i32, %arg1: i32, %arg2: memref<8x128xf32, #tpu.memory_space<vmem>>, %arg3: memref<1x8x128xf32, #tpu.memory_space<vmem>>, %arg4: memref<128x384xbf16, #tpu.memory_space<vmem>>, %arg5: memref<8x128xf32, #tpu.memory_space<vmem>>, %arg6: memref<1x8x128xf32, #tpu.memory_space<vmem>>) attributes {dimension_semantics = [#tpu.dimension_semantics<arbitrary>, #tpu.dimension_semantics<arbitrary>], iteration_bounds = array<i64: 1, 1>, scalar_prefetch = 0 : i64, scratch_operands = 0 : i64, tpu.core_type = #tpu.core_type<tc>, window_params = [{pipeline_mode = #tpu.pipeline_mode<synchronous>, transform_indices = @transform_0, window_bounds = array<i64: 8, 128>}, {transform_indices = @transform_1, window_bounds = array<i64: 1, 8, 128>}, {transform_indices = @transform_2, window_bounds = array<i64: 128, 384>}, {pipeline_mode = #tpu.pipeline_mode<synchronous>, transform_indices = @transform_3, window_bounds = array<i64: 8, 128>}, {transform_indices = @transform_4, window_bounds = array<i64: 1, 8, 128>}]} {
    %c0_i32 = arith.constant 0 : i32
    %0 = arith.cmpi eq, %arg0, %c0_i32 : i32
    %c0_i32_0 = arith.constant 0 : i32
    %1 = arith.cmpi eq, %arg1, %c0_i32_0 : i32
    %2 = arith.andi %0, %1 : i1
    %3 = arith.extui %2 : i1 to i32
    %c0_i32_1 = arith.constant 0 : i32
    %4 = arith.cmpi ne, %3, %c0_i32_1 : i32
    scf.if %4 {
      %cst_20 = arith.constant 0.000000e+00 : f32
      %43 = vector.broadcast %cst_20 : f32 to vector<8x128xf32>
      %c0_21 = arith.constant 0 : index
      %c0_22 = arith.constant 0 : index
      %44 = vector.load %arg5[%c0_21, %c0_22] : memref<8x128xf32, #tpu.memory_space<vmem>>, vector<8x128xf32>
      tpu.vector_store %arg5[%c0_21, %c0_22], %43 {strides = array<i32>} : memref<8x128xf32, #tpu.memory_space<vmem>>, vector<8x128xf32>,
    } else {
    }
    %c0 = arith.constant 0 : index
    %c0_2 = arith.constant 0 : index
    %5 = vector.load %arg2[%c0, %c0_2] : memref<8x128xf32, #tpu.memory_space<vmem>>, vector<8x128xf32>
    %c0_3 = arith.constant 0 : index
    %c0_4 = arith.constant 0 : index
    %c0_5 = arith.constant 0 : index
    %6 = vector.load %arg3[%c0_3, %c0_4, %c0_5] : memref<1x8x128xf32, #tpu.memory_space<vmem>>, vector<1x8x128xf32>
    %7 = vector.shape_cast %6 : vector<1x8x128xf32> to vector<8x128xf32>
    %8 = arith.addf %5, %7 : vector<8x128xf32>
    %c0_6 = arith.constant 0 : index
    %c0_7 = arith.constant 0 : index
    %c0_8 = arith.constant 0 : index
    %9 = vector.load %arg6[%c0_6, %c0_7, %c0_8] : memref<1x8x128xf32, #tpu.memory_space<vmem>>, vector<1x8x128xf32>
    %10 = vector.shape_cast %9 : vector<1x8x128xf32> to vector<8x128xf32>
    %11 = vector.shape_cast %8 : vector<8x128xf32> to vector<1x8x128xf32>
    tpu.vector_store %arg6[%c0_6, %c0_7, %c0_8], %11 {strides = array<i32>} : memref<1x8x128xf32, #tpu.memory_space<vmem>>, vector<1x8x128xf32>,
    %c0_9 = arith.constant 0 : index
    %c0_10 = arith.constant 0 : index
    %12 = vector.load %arg4[%c0_9, %c0_10] : memref<128x384xbf16, #tpu.memory_space<vmem>>, vector<128x384xbf16>
    %13 = arith.extf %12 : vector<128x384xbf16> to vector<128x384xf32>
    %cst = arith.constant dense<0.000000e+00> : vector<8x384xf32>
    %14 = tpu.matmul %8, %13, %cst {dimension_numbers = #tpu.dot_dimension_numbers<[1], [0], [0], [1], [0, 0, 1, 1], [], []>} : vector<8x128xf32>, vector<128x384xf32>, vector<8x384xf32> -> vector<8x384xf32>
    %15 = arith.mulf %14, %14 : vector<8x384xf32>
    %16 = vector.extract_strided_slice %15 {offsets = [0, 0], sizes = [1, 384], strides = [1, 1]} : vector<8x384xf32> to vector<1x384xf32>
    %17 = vector.extract_strided_slice %15 {offsets = [1, 0], sizes = [1, 384], strides = [1, 1]} : vector<8x384xf32> to vector<1x384xf32>
    %18 = arith.addf %16, %17 : vector<1x384xf32>
    %19 = vector.extract_strided_slice %15 {offsets = [2, 0], sizes = [1, 384], strides = [1, 1]} : vector<8x384xf32> to vector<1x384xf32>
    %20 = arith.addf %18, %19 : vector<1x384xf32>
    %21 = math.sqrt %20 : vector<1x384xf32>
    %c128_i32 = arith.constant 128 : i32
    %22 = tpu.dynamic_rotate %21 by %c128_i32 dim 1 : vector<1x384xf32>, i32 -> vector<1x384xf32>
    %23 = arith.subf %21, %22 : vector<1x384xf32>
    %24 = arith.mulf %23, %23 : vector<1x384xf32>
    %25 = vector.shape_cast %24 : vector<1x384xf32> to vector<1x1x384xf32>
    %cst_11 = arith.constant dense<0.000000e+00> : vector<1xf32>
    %26 = vector.multi_reduction <add>, %25, %cst_11 [1, 2] : vector<1x1x384xf32> to vector<1xf32>
    %27 = vector.shape_cast %26 : vector<1xf32> to vector<1x1x1xf32>
    %28 = vector.extract %27[0, 0, 0] : f32 from vector<1x1x1xf32>
    %29 = tpu.iota {dimensions = array<i32: 1>} : vector<8x128xi32>
    %c0_12 = arith.constant 0 : index
    %c0_13 = arith.constant 0 : index
    %30 = vector.load %arg5[%c0_12, %c0_13] : memref<8x128xf32, #tpu.memory_space<vmem>>, vector<8x128xf32>
    %31 = vector.broadcast %arg1 : i32 to vector<8x128xi32>
    %32 = arith.cmpi eq, %29, %31 : vector<8x128xi32>
    %cst_14 = arith.constant 0.000000e+00 : f32
    %33 = vector.broadcast %28 : f32 to vector<8x128xf32>
    %34 = vector.broadcast %cst_14 : f32 to vector<8x128xf32>
    %35 = arith.select %32, %33, %34 : vector<8x128xi1>, vector<8x128xf32>
    %36 = arith.addf %30, %35 : vector<8x128xf32>
    %c0_15 = arith.constant 0 : index
    %c0_16 = arith.constant 0 : index
    %37 = vector.load %arg5[%c0_15, %c0_16] : memref<8x128xf32, #tpu.memory_space<vmem>>, vector<8x128xf32>
    tpu.vector_store %arg5[%c0_15, %c0_16], %36 {strides = array<i32>} : memref<8x128xf32, #tpu.memory_space<vmem>>, vector<8x128xf32>,
    %c0_i32_17 = arith.constant 0 : i32
    %38 = arith.cmpi eq, %arg0, %c0_i32_17 : i32
    %c0_i32_18 = arith.constant 0 : i32
    %39 = arith.cmpi eq, %arg1, %c0_i32_18 : i32
    %40 = arith.andi %38, %39 : i1
    %41 = arith.extui %40 : i1 to i32
    %c0_i32_19 = arith.constant 0 : i32
    %42 = arith.cmpi ne, %41, %c0_i32_19 : i32
    scf.if %42 {
      %c0_20 = arith.constant 0 : index
      %c0_21 = arith.constant 0 : index
      %43 = vector.load %arg5[%c0_20, %c0_21] : memref<8x128xf32, #tpu.memory_space<vmem>>, vector<8x128xf32>
      %cst_22 = arith.constant 0.010416667 : f32
      %44 = vector.broadcast %cst_22 : f32 to vector<8x128xf32>
      %45 = arith.mulf %43, %44 : vector<8x128xf32>
      %c0_23 = arith.constant 0 : index
      %c0_24 = arith.constant 0 : index
      %46 = vector.load %arg5[%c0_23, %c0_24] : memref<8x128xf32, #tpu.memory_space<vmem>>, vector<8x128xf32>
      tpu.vector_store %arg5[%c0_23, %c0_24], %45 {strides = array<i32>} : memref<8x128xf32, #tpu.memory_space<vmem>>, vector<8x128xf32>,
    } else {
    }
    return
  }
  func.func @transform_0(%arg0: i32, %arg1: i32) -> (i32, i32) {
    %c0_i32 = arith.constant 0 : i32
    %c0_i32_0 = arith.constant 0 : i32
    %c0_i32_1 = arith.constant 0 : i32
    return %c0_i32, %c0_i32_0 : i32, i32
  }
  func.func @transform_1(%arg0: i32, %arg1: i32) -> (i32, i32, i32) {
    %c0_i32 = arith.constant 0 : i32
    %c0_i32_0 = arith.constant 0 : i32
    %c0_i32_1 = arith.constant 0 : i32
    return %arg1, %c0_i32, %c0_i32_0 : i32, i32, i32
  }
  func.func @transform_2(%arg0: i32, %arg1: i32) -> (i32, i32) {
    %c0_i32 = arith.constant 0 : i32
    %c0_i32_0 = arith.constant 0 : i32
    return %c0_i32, %arg0 : i32, i32
  }
  func.func @transform_3(%arg0: i32, %arg1: i32) -> (i32, i32) {
    %c0_i32 = arith.constant 0 : i32
    %c0_i32_0 = arith.constant 0 : i32
    %c0_i32_1 = arith.constant 0 : i32
    return %c0_i32, %c0_i32_0 : i32, i32
  }
  func.func @transform_4(%arg0: i32, %arg1: i32) -> (i32, i32, i32) {
    %c0_i32 = arith.constant 0 : i32
    %c0_i32_0 = arith.constant 0 : i32
    %c0_i32_1 = arith.constant 0 : i32
    return %arg1, %c0_i32, %c0_i32_0 : i32, i32, i32
  }
}

</mosaic_0001>

<bundles_post_ra>
// kernel: tpu_custom_call.1
= control target key start
LH: loop header
LB: loop body
LE: loop exit
PB: predicated region body
PF: predicated region fallthrough
CT: control target
= control target key end

     0   :  { %10 = vsyncpa [#allocation3], 0  ;;  %s538_s0 = inlined_call_operand.hbm [shape: f32[8,128], index: 0, kind: input, shape index: {}]   ;;  %s539_s1 = inlined_call_operand.hbm [shape: f32[1,8,128], index: 1, kind: input, shape index: {}]   ;;  %s540_s2 = inlined_call_operand.hbm [shape: bf16[128,384], index: 2, kind: input, shape index: {}]   ;;  %s541_s3 = inlined_call_operand.hbm [shape: f32[8,128], index: 3, kind: output, shape index: {0}]   ;;  %s542_s4 = inlined_call_operand.hbm [shape: f32[1,8,128], index: 4, kind: output, shape index: {1}]  }
   0x1   :  { %11 = vsyncpa [#allocation6], 0 }
   0x2   :  { %12 = vsyncpa [#allocation4], 0  ;;  %s30_s17 = sshll.u32 %s539_s1, 4  ;;  %s31_s17 = int_to_ptr.hbm [resolvable:$true] %s30_s17 }
   0x3   :  { %13 = vsyncpa [#allocation10], 0  ;;  %s485_s18 = smov [#allocation5]   ;;  %s19_s22 = sshll.u32 %s538_s0, 4  ;;  %s20_s22 = int_to_ptr.hbm [resolvable:$true] %s19_s22 }
   0x4   :  { %s32_s19 = sshll.u32 %s485_s18, 4  ;;  %s486_s23 = smov [#allocation2]   ;;  %s33_s19 = int_to_ptr.vmem [resolvable:$true] %s32_s19 }
   0x5   :  { %35 = dma.hbm_to_vmem [thread:$0]  %s31_s17, 128, %s33_s19, [#allocation6]  }
   0x6   :  { %s21_s24 = sshll.u32 %s486_s23, 4  ;;  %s40_s27 = sshll.u32 %s540_s2, 4  ;;  %s22_s24 = int_to_ptr.vmem [resolvable:$true] %s21_s24  ;;  %s41_s27 = int_to_ptr.hbm [resolvable:$true] %s40_s27 }
   0x7   :  { %24 = dma.hbm_to_vmem [thread:$0]  %s20_s22, 128, %s22_s24, [#allocation3]  }
   0x8   :  { %s487_s1 = smov [#allocation7]   ;;  %s488_s29 = smov 192  }
   0x9   :  { %s42_s28 = sshll.u32 %s487_s1, 4  ;;  %s489_s30 = smov 12   ;;  %s43_s28 = int_to_ptr.vmem [resolvable:$true] %s42_s28 }
   0xa   :  { %48 = dma.hbm_to_vmem [thread:$0]  %s41_s27, 3072, %s43_s28, [#allocation6], %s488_s29, %s488_s29, %s489_s30  }
   0xb   :  { %477 = dma.done.wait [#allocation3], 128  }
   0xc   :  { %478 = vsyncadd [#allocation3], 4294967168 }
   0xd   :  { %479 = dma.done.wait [#allocation6], 3200  }
   0xe   :  { %480 = vsyncadd [#allocation6], 4294964096  ;;  %v102_v0 = vld [vmem:[#allocation7 + $0xb4] sm:$0xff]  ;;  %v103_v1 = vld [vmem:[#allocation7 + $0xbc] sm:$0xf]  ;;  %vm278_vm6 = vcmask 1040384  }
   0xf   :  { %v100_v2 = vld [vmem:[#allocation7 + $0xa8] sm:$0xff]  ;;  %v149_v3 = vunpack.c.l.bf16 %v102_v0  ;;  %v150_v4 = vunpack.c.h.bf16 %v102_v0  ;;  %v151_v5 = vunpack.c.l.bf16 %v103_v1  ;;  %v101_v7 = vld [vmem:[#allocation7 + $0xb0] sm:$0xf]  ;;  %v98_v8 = vld [vmem:[#allocation7 + $0x9c] sm:$0xff]  ;;  %s490_s0 = smov [#allocation9]   ;;  %s325_s7 = sshll.u32 %s542_s4, 4  ;;  %s326_s7 = int_to_ptr.hbm [resolvable:$true] %s325_s7 }
  0x10   :  { %v146_v6 = vunpack.c.l.bf16 %v100_v2  ;;  %v99_v9 = vld [vmem:[#allocation7 + $0xa4] sm:$0xf]  ;;  %v147_v10 = vunpack.c.h.bf16 %v100_v2  ;;  %v148_v11 = vunpack.c.l.bf16 %v101_v7  ;;  %v96_v12 = vld [vmem:[#allocation7 + $0x90] sm:$0xff]  ;;  %v143_v13 = vunpack.c.l.bf16 %v98_v8  ;;  %v97_v15 = vld [vmem:[#allocation7 + $0x98] sm:$0xf]  ;;  %s323_s2 = sshll.u32 %s490_s0, 4  ;;  %s324_s2 = int_to_ptr.vmem [resolvable:$true] %s323_s2 }
  0x11   :  { %152 = vmatpush.msra.mxu0 %v149_v3  ;;  %172 = vmatpush.msra.mxu1 %v150_v4  ;;  %v144_v14 = vunpack.c.h.bf16 %v98_v8  ;;  %v145_v16 = vunpack.c.l.bf16 %v99_v9  ;;  %v94_v17 = vld [vmem:[#allocation7 + $0x84] sm:$0xff]  ;;  %v140_v18 = vunpack.c.l.bf16 %v96_v12  ;;  %v141_v19 = vunpack.c.h.bf16 %v96_v12  ;;  %v95_v20 = vld [vmem:[#allocation7 + $0x8c] sm:$0xf]  ;;  %v92_v22 = vld [vmem:[#allocation7 + $0x78] sm:$0xff]  ;;  %s491_s9 = smov [#allocation8]   ;;  %s314_s12 = sshll.u32 %s541_s3, 4  ;;  %s315_s12 = int_to_ptr.hbm [resolvable:$true] %s314_s12 }
  0x12   :  { %192 = vmatpush.msra.mxu2 %v151_v5  ;;  %v142_v21 = vunpack.c.l.bf16 %v97_v15  ;;  %v137_v23 = vunpack.c.l.bf16 %v94_v17  ;;  %v138_v24 = vunpack.c.h.bf16 %v94_v17  ;;  %v93_v25 = vld [vmem:[#allocation7 + $0x80] sm:$0xf]  ;;  %v139_v26 = vunpack.c.l.bf16 %v95_v20  ;;  %v90_v27 = vld [vmem:[#allocation7 + $0x6c] sm:$0xff]  ;;  %v91_v30 = vld [vmem:[#allocation7 + $0x74] sm:$0xf]  ;;  %s312_s10 = sshll.u32 %s491_s9, 4  ;;  %s313_s10 = int_to_ptr.vmem [resolvable:$true] %s312_s10 }
  0x13   :  { %153 = vmatpush.msra.mxu0 %v146_v6  ;;  %173 = vmatpush.msra.mxu1 %v147_v10  ;;  %v134_v28 = vunpack.c.l.bf16 %v92_v22  ;;  %v135_v29 = vunpack.c.h.bf16 %v92_v22  ;;  %v136_v31 = vunpack.c.l.bf16 %v93_v25  ;;  %v88_v32 = vld [vmem:[#allocation7 + $0x60] sm:$0xff]  ;;  %v68_v33 = vld [vmem:[#allocation2] sm:$0xff]  ;;  %v131_v34 = vunpack.c.l.bf16 %v90_v27  ;;  %v89_v36 = vld [vmem:[#allocation7 + $0x68] sm:$0xf] }
  0x14   :  { %193 = vmatpush.msra.mxu2 %v148_v11  ;;  %v132_v35 = vunpack.c.h.bf16 %v90_v27  ;;  %v69_v37 = vld [vmem:[#allocation5] sm:$0xff]  ;;  %v133_v38 = vunpack.c.l.bf16 %v91_v30  ;;  %v128_v40 = vunpack.c.l.bf16 %v88_v32  ;;  %v129_v41 = vunpack.c.h.bf16 %v88_v32  ;;  %v84_v45 = vld [vmem:[#allocation7 + $0x48] sm:$0xff]  ;;  %v85_v48 = vld [vmem:[#allocation7 + $0x50] sm:$0xf] }
  0x15   :  { %154 = vmatpush.msra.mxu0 %v143_v13  ;;  %174 = vmatpush.msra.mxu1 %v144_v14  ;;  %v86_v39 = vld [vmem:[#allocation7 + $0x54] sm:$0xff]  ;;  %v87_v42 = vld [vmem:[#allocation7 + $0x5c] sm:$0xf]  ;;  %v526_v43 = vadd.f32 %v69_v37, %v68_v33  ;;  %v130_v44 = vunpack.c.l.bf16 %v89_v36  ;;  %v122_v51 = vunpack.c.l.bf16 %v84_v45  ;;  %v123_v52 = vunpack.c.h.bf16 %v84_v45  ;;  %v83_v53 = vld [vmem:[#allocation7 + $0x44] sm:$0xf] }
  0x16   :  { %194 = vmatpush.msra.mxu2 %v145_v16  ;;  %v125_v46 = vunpack.c.l.bf16 %v86_v39  ;;  %v126_v47 = vunpack.c.h.bf16 %v86_v39  ;;  %v127_v49 = vunpack.c.l.bf16 %v87_v42  ;;  %v82_v50 = vld [vmem:[#allocation7 + $0x3c] sm:$0xff]  ;;  %v124_v54 = vunpack.c.l.bf16 %v85_v48  ;;  %v80_v55 = vld [vmem:[#allocation7 + $0x30] sm:$0xff]  ;;  %v81_v58 = vld [vmem:[#allocation7 + $0x38] sm:$0xf] }
  0x17   :  { %155 = vmatpush.msra.mxu0 %v140_v18  ;;  %175 = vmatpush.msra.mxu1 %v141_v19  ;;  %71 = vst [vmem:[#allocation9] sm:$0xff] %v526_v43  ;;  %v119_v56 = vunpack.c.l.bf16 %v82_v50  ;;  %v120_v57 = vunpack.c.h.bf16 %v82_v50  ;;  %v121_v59 = vunpack.c.l.bf16 %v83_v53  ;;  %v78_v60 = vld [vmem:[#allocation7 + $0x24] sm:$0xff]  ;;  %v116_v61 = vunpack.c.l.bf16 %v80_v55  ;;  %v79_v63 = vld [vmem:[#allocation7 + $0x2c] sm:$0xf]  ;;  %v76_v1 = vld [vmem:[#allocation7 + $0x18] sm:$0xff] }
  0x18   :  { %195 = vmatpush.msra.mxu2 %v142_v21  ;;  %v117_v62 = vunpack.c.h.bf16 %v80_v55  ;;  %v118_v0 = vunpack.c.l.bf16 %v81_v58  ;;  %v113_v2 = vunpack.c.l.bf16 %v78_v60  ;;  %v114_v3 = vunpack.c.h.bf16 %v78_v60  ;;  %v77_v4 = vld [vmem:[#allocation7 + $0x20] sm:$0xf]  ;;  %v74_v6 = vld [vmem:[#allocation7 + $0xc] sm:$0xff]  ;;  %v75_v9 = vld [vmem:[#allocation7 + $0x14] sm:$0xf] }
  0x19   :  { %156 = vmatpush.msra.mxu0 %v137_v23  ;;  %176 = vmatpush.msra.mxu1 %v138_v24  ;;  %v115_v5 = vunpack.c.l.bf16 %v79_v63  ;;  %v110_v7 = vunpack.c.l.bf16 %v76_v1  ;;  %v111_v8 = vunpack.c.h.bf16 %v76_v1  ;;  %v112_v10 = vunpack.c.l.bf16 %v77_v4  ;;  %v72_v11 = vld [vmem:[#allocation7] sm:$0xff]  ;;  %v73_v14 = vld [vmem:[#allocation7 + $0x8] sm:$0xf]  ;;  %328 = dma.vmem_to_hbm [thread:$0]  %s324_s2, 128, %s326_s7, [#allocation10]  }
  0x1a   :  { %196 = vmatpush.msra.mxu2 %v139_v26  ;;  %v107_v12 = vunpack.c.l.bf16 %v74_v6  ;;  %v108_v13 = vunpack.c.h.bf16 %v74_v6  ;;  %v109_v15 = vunpack.c.l.bf16 %v75_v9  ;;  %v104_v16 = vunpack.c.l.bf16 %v72_v11 }
  0x1b   :  { %157 = vmatpush.msra.mxu0 %v134_v28  ;;  %177 = vmatpush.msra.mxu1 %v135_v29  ;;  %v105_v17 = vunpack.c.h.bf16 %v72_v11  ;;  %v106_v18 = vunpack.c.l.bf16 %v73_v14 }
  0x1c   :  { %197 = vmatpush.msra.mxu2 %v136_v31 }
  0x1d   :  { %158 = vmatpush.msra.mxu0 %v131_v34  ;;  %178 = vmatpush.msra.mxu1 %v132_v35 }
  0x1e   :  { %198 = vmatpush.msra.mxu2 %v133_v38 }
  0x1f   :  { %159 = vmatpush.msra.mxu0 %v128_v40  ;;  %179 = vmatpush.msra.mxu1 %v129_v41 }
  0x20   :  { %199 = vmatpush.msra.mxu2 %v130_v44 }
  0x21   :  { %160 = vmatpush.msra.mxu0 %v125_v46  ;;  %180 = vmatpush.msra.mxu1 %v126_v47 }
  0x22   :  { %200 = vmatpush.msra.mxu2 %v127_v49 }
  0x23   :  { %161 = vmatpush.msra.mxu0 %v122_v51  ;;  %181 = vmatpush.msra.mxu1 %v123_v52 }
  0x24   :  { %201 = vmatpush.msra.mxu2 %v124_v54 }
  0x25   :  { %162 = vmatpush.msra.mxu0 %v119_v56  ;;  %182 = vmatpush.msra.mxu1 %v120_v57 }
  0x26   :  { %202 = vmatpush.msra.mxu2 %v121_v59 }
  0x27   :  { %163 = vmatpush.msra.mxu0 %v116_v61  ;;  %183 = vmatpush.msra.mxu1 %v117_v62 }
  0x28   :  { %203 = vmatpush.msra.mxu2 %v118_v0 }
  0x29   :  { %164 = vmatpush.msra.mxu0 %v113_v2  ;;  %184 = vmatpush.msra.mxu1 %v114_v3 }
  0x2a   :  { %204 = vmatpush.msra.mxu2 %v115_v5 }
  0x2b   :  { %165 = vmatpush.msra.mxu0 %v110_v7  ;;  %185 = vmatpush.msra.mxu1 %v111_v8 }
  0x2c   :  { %205 = vmatpush.msra.mxu2 %v112_v10 }
  0x2d   :  { %166 = vmatpush.msra.mxu0 %v107_v12  ;;  %186 = vmatpush.msra.mxu1 %v108_v13 }
  0x2e   :  { %206 = vmatpush.msra.mxu2 %v109_v15 }
  0x2f   :  { %167 = vmatpush.msra.mxu0 %v104_v16  ;;  %187 = vmatpush.msra.mxu1 %v105_v17 }
  0x30   :  { %207 = vmatpush.msra.mxu2 %v106_v18  ;;  %168 = vmatmul.f32.vlgmr.msra.gmra.mxu0 %v526_v43 }
  0x31   :  { %188 = vmatmul.f32.vlgmr.msra.gmra.mxu1 %v526_v43  ;;  %208 = vmatmul.f32.vlgmr.msra.gmra.mxu2 %v526_v43 }
  0xad   :  { %v169_v19 = vpop.f32.mrf.mxu0 }
  0xae   :  { %v212_v20 = vmul.f32 %v169_v19, %v169_v19  ;;  %v189_v21 = vpop.f32.mrf.mxu1 }
  0xaf   :  { %v213_v22 = vmul.f32 %v189_v21, %v189_v21  ;;  %v293_v21 = vlaneseq }
  0xb0   :  { %v218_v23 = vrot.slane %v212_v20, 1  ;;  %v227_v24 = vrot.slane %v212_v20, 2 }
  0xb1   :  { %v219_v25 = vrot.slane %v213_v22, 1  ;;  %v228_v26 = vrot.slane %v213_v22, 2 }
  0xb2   :  { %v224_v27 = vadd.f32 %v218_v23, %v212_v20 }
  0xb3   :  { %v225_v28 = vadd.f32 %v219_v25, %v213_v22  ;;  %v294_v22 = vand.u32 127, %v293_v21 }
  0xb4   :  { %v233_v29 = vadd.f32 %v227_v24, %v224_v27  ;;  %v209_v30 = vpop.f32.mrf.mxu2 }
  0xb5   :  { %v234_v31 = vadd.f32 %v228_v26, %v225_v28  ;;  %v214_v32 = vmul.f32 %v209_v30, %v209_v30  ;;  %vm297_vm7 = vcmp.eq.s32.totalorder %v294_v22, 0 }
  0xb6   :  { %351 = vrsqrt.f32 %v233_v29  ;;  %vm243_vm0 = vcmp.eq.f32.partialorder %v233_v29, inf  ;;  %v246_v56 = vand.u32 2147483648, %v233_v29  ;;  %vm245_vm2 = vcmp.eq.f32.partialorder %v233_v29, 0.0 }
  0xb7   :  { %v220_v33 = vrot.slane %v214_v32, 1  ;;  %353 = vrsqrt.f32 %v234_v31  ;;  %v229_v35 = vrot.slane %v214_v32, 2  ;;  %vm255_vm1 = vcmp.eq.f32.partialorder %v234_v31, inf }
  0xb8   :  { %v258_v57 = vand.u32 2147483648, %v234_v31  ;;  %vm257_vm3 = vcmp.eq.f32.partialorder %v234_v31, 0.0 }
  0xb9   :  { %v226_v34 = vadd.f32 %v220_v33, %v214_v32 }
  0xbb   :  { %v235_v36 = vadd.f32 %v229_v35, %v226_v34 }
  0xbc   :  { %v352_v37 = vpop.eup %351 }
  0xbd   :  { %v354_v38 = vpop.eup %353  ;;  %v237_v39 = vmul.f32 %v352_v37, %v233_v29  ;;  %355 = vrsqrt.f32 %v235_v36  ;;  %vm267_vm4 = vcmp.eq.f32.partialorder %v235_v36, inf  ;;  %v270_v1 = vand.u32 2147483648, %v235_v36 }
  0xbe   :  { %v249_v40 = vmul.f32 %v354_v38, %v234_v31  ;;  %vm269_vm5 = vcmp.eq.f32.partialorder %v235_v36, 0.0 }
  0xbf   :  { %v238_v41 = vmul.f32 %v352_v37, %v237_v39 }
  0xc0   :  { %v250_v42 = vmul.f32 %v354_v38, %v249_v40 }
  0xc1   :  { %v239_v43 = vmul.f32 0.5, %v238_v41 }
  0xc2   :  { %v251_v44 = vmul.f32 0.5, %v250_v42 }
  0xc3   :  { %v356_v45 = vpop.eup %355  ;;  %v240_v46 = vsub.f32 1.5, %v239_v43 }
  0xc4   :  { %v252_v47 = vsub.f32 1.5, %v251_v44  ;;  %v261_v48 = vmul.f32 %v356_v45, %v235_v36 }
  0xc5   :  { %v241_v49 = vmul.f32 %v352_v37, %v240_v46 }
  0xc6   :  { %v253_v50 = vmul.f32 %v354_v38, %v252_v47  ;;  %v262_v51 = vmul.f32 %v356_v45, %v261_v48 }
  0xc7   :  { %v242_v52 = vmul.f32 %v241_v49, %v233_v29 }
  0xc8   :  { %v254_v53 = vmul.f32 %v253_v50, %v234_v31  ;;  %v263_v54 = vmul.f32 0.5, %v262_v51 }
  0xc9   :  { %v244_v55 = vsel %vm243_vm0, %v233_v29, %v242_v52 }
  0xca   :  { %v256_v58 = vsel %vm255_vm1, %v234_v31, %v254_v53  ;;  %v264_v59 = vsub.f32 1.5, %v263_v54  ;;  %v247_v60 = vsel %vm245_vm2, %v246_v56, %v244_v55 }
  0xcb   :  { %v259_v61 = vsel %vm257_vm3, %v258_v57, %v256_v58 }
  0xcc   :  { %v265_v62 = vmul.f32 %v356_v45, %v264_v59  ;;  %v273_v0 = vsub.f32 %v259_v61, %v247_v60 }
  0xce   :  { %v266_v63 = vmul.f32 %v265_v62, %v235_v36  ;;  %v276_v6 = vmul.f32 %v273_v0, %v273_v0 }
  0xd0   :  { %v268_v2 = vsel %vm267_vm4, %v235_v36, %v266_v63  ;;  %v280_v10 = vsel %vm278_vm6, %v276_v6, 0.0 }
  0xd1   :  { %v271_v3 = vsel %vm269_vm5, %v270_v1, %v268_v2 }
  0xd2   :  { %v272_v4 = vsub.f32 %v247_v60, %v271_v3  ;;  %v274_v5 = vsub.f32 %v271_v3, %v259_v61 }
  0xd4   :  { %v275_v7 = vmul.f32 %v272_v4, %v272_v4  ;;  %v277_v8 = vmul.f32 %v274_v5, %v274_v5 }
  0xd6   :  { %v279_v9 = vsel %vm278_vm6, %v275_v7, 0.0  ;;  %v282_v12 = vsel %vm278_vm6, %v277_v8, 0.0 }
  0xd7   :  { %v281_v11 = vadd.f32 %v280_v10, %v279_v9 }
  0xd9   :  { %v283_v13 = vadd.f32 %v282_v12, %v281_v11 }
  0xdb   :  { %284 = vadd.xlane.f32.xlu0 %v283_v13 }
 0x14e   :  { %v285_v14 = vpop.xlane.xlu0 %284 }
 0x14f   :  { %v286_v15 = vrot.slane %v285_v14, 4 }
 0x151   :  { %v287_v16 = vadd.f32 %v286_v15, %v285_v14 }
 0x153   :  { %v288_v17 = vrot.slane %v287_v16, 2 }
 0x155   :  { %v289_v18 = vadd.f32 %v288_v17, %v287_v16 }
 0x157   :  { %v290_v19 = vrot.slane %v289_v18, 1 }
 0x159   :  { %v291_v20 = vadd.f32 %v290_v19, %v289_v18 }
 0x15b   :  { %341 = vpush %v291_v20 }
 0x18c   :  { %s342_s8 = spop %341 }
 0x18d   :  { %v298_v23 = vstv %s342_s8 }
 0x18e   :  { %v299_v24 = vsel %vm297_vm7, %v298_v23, 0.0 }
 0x18f   :  { %v305_v25 = vmul.f32 0.010416667, %v299_v24 }
 0x191   :  { %306 = vst [vmem:[#allocation8] sm:$0xff] %v305_v25 }
 0x192   :  { %317 = dma.vmem_to_hbm [thread:$0]  %s313_s10, 128, %s315_s12, [#allocation4]  }
 0x193   :  { %481 = dma.done.wait [#allocation4], 128  }
 0x194   :  { %482 = vsyncadd [#allocation4], 4294967168 }
 0x195   :  { %483 = dma.done.wait [#allocation10], 128  }
 0x196   :  { %484 = vsyncadd [#allocation10], 4294967168 }
 0x197   :  { %337 = vsyncpa [#allocation3], 1 }
 0x198   :  { %338 = vsyncpa [#allocation6], 1 }
 0x199   :  { %339 = vsyncpa [#allocation4], 1 }
 0x19a   :  { %340 = vsyncpa [#allocation10], 1 }

</bundles_post_ra>
